<compile_context>
chip_gen: v7x
topology: tpu7x:2x2x1
jax: 0.10.0
libtpu: 0.0.40
codegen_flags: <defaults>
</compile_context>

<pallas_src>
import jax
import jax.numpy as jnp
from jax.experimental import pallas as pl
from jax.experimental.pallas import tpu as pltpu

STATE_SIZE = 4      # CartPole-v1 observation dim
ACTION_SIZE = 2     # CartPole-v1 action dim (unused by Critic.forward)
H1, H2, OUT = 128, 256, 1

# Packed parameter slab layout (single f32 (P_ROWS, P_COLS) buffer -> one DMA):
#   rows 0..3 , cols 0:128 : w1   (4, 128)
#   row  4    , cols 0:128 : b1   (128,)
#   row  5    , cols 0:256 : w3 as a lane row (256,)
#   row  6    , col  0     : b3   scalar
#   row  7    , cols 0:256 : b2   (256,)
#   rows 8..135, cols 0:256: w2   (128, 256)
P_COLS = H2
P_ROWS = 8 + H1


def _round_up(x, m):
    return (x + m - 1) // m * m


def critic_kernel(x_ref, p_ref, out_ref):
    tb = x_ref.shape[0]
    x = x_ref[...]                       # (tb, 4) f32
    head = p_ref[0:8, :]                 # (8, 256): w1 rows / b1 / w3 / b3 / b2
    w2 = p_ref[8:, :]                    # (128, 256)

    # ---- layer 1: K=4 -> 4 VPU FMAs (MXU would be almost entirely zero padding)
    acc = x[:, 0:1] * head[0:1, 0:H1]
    for k in range(1, STATE_SIZE):       # static unroll (4 taps)
        acc = acc + x[:, k:k + 1] * head[k:k + 1, 0:H1]
    h1 = jnp.maximum(acc + head[4:5, 0:H1], 0.0)          # + b1, ReLU

    # ---- layer 2: the only real matmul -> MXU with f32 accumulation
    h2 = jnp.dot(h1, w2, preferred_element_type=jnp.float32) + head[7:8, :]
    h2 = jnp.maximum(h2, 0.0)

    # ---- layer 3: N=1 -> VPU multiply + lane (XLU) reduction instead of MXU
    v = jnp.sum(h2 * head[5:6, :], axis=-1, keepdims=True) + head[6:7, 0:1]
    out_ref[...] = v.astype(out_ref.dtype)


def pack_params(params):
    """Pack (w1, b1, w2, b2, w3, b3) into one (P_ROWS, P_COLS) f32 slab."""
    w1, b1, w2, b2, w3, b3 = params
    p = jnp.zeros((P_ROWS, P_COLS), jnp.float32)
    p = p.at[0:STATE_SIZE, 0:H1].set(w1.astype(jnp.float32))
    p = p.at[4, 0:H1].set(b1.reshape(-1).astype(jnp.float32))
    p = p.at[5, 0:H2].set(w3.reshape(-1).astype(jnp.float32))
    p = p.at[6, 0].set(jnp.reshape(b3, ()).astype(jnp.float32))
    p = p.at[7, 0:H2].set(b2.reshape(-1).astype(jnp.float32))
    p = p.at[8:, :].set(w2.astype(jnp.float32))
    return p


def critic_forward(state, packed_params, *, tb=None):
    """state: (B, 4) f32; packed_params: (P_ROWS, P_COLS) f32 from pack_params."""
    B = state.shape[0]
    if tb is None:
        # per-block activations (tb,256) f32 stay tiny; safe on v7x's 64 MiB VMEM too
        tb = min(512, _round_up(max(B, 1), 8))
    tb = _round_up(tb, 8)
    Bp = _round_up(B, tb)
    if Bp != B:
        state = jnp.pad(state, ((0, Bp - B), (0, 0)))

    out = pl.pallas_call(
        critic_kernel,
        out_shape=jax.ShapeDtypeStruct((Bp, OUT), jnp.float32),
        grid=(Bp // tb,),
        in_specs=[
            pl.BlockSpec((tb, STATE_SIZE), lambda i: (i, 0)),
            pl.BlockSpec((P_ROWS, P_COLS), lambda i: (0, 0)),  # weights resident across steps
        ],
        out_specs=pl.BlockSpec((tb, OUT), lambda i: (i, 0)),
        compiler_params=pltpu.CompilerParams(
            dimension_semantics=("parallel",)),  # lets v7x shard the batch axis over 2 TCs
    )(state.astype(jnp.float32), packed_params)
    return out[:B]


def init_params(key):
    """Deterministic init mimicking torch.nn.Linear default: U(-1/sqrt(fan_in), 1/sqrt(fan_in))."""
    ks = jax.random.split(key, 6)

    def linear(kw, kb, fan_in, fan_out):
        bound = 1.0 / jnp.sqrt(jnp.float32(fan_in))
        w = jax.random.uniform(kw, (fan_in, fan_out), jnp.float32, -bound, bound)
        b = jax.random.uniform(kb, (fan_out,), jnp.float32, -bound, bound)
        return w, b

    w1, b1 = linear(ks[0], ks[1], STATE_SIZE, H1)
    w2, b2 = linear(ks[2], ks[3], H1, H2)
    w3, b3 = linear(ks[4], ks[5], H2, OUT)
    return (w1, b1, w2, b2, w3, b3)


def critic_ref(state, params):
    w1, b1, w2, b2, w3, b3 = params
    h1 = jnp.maximum(state @ w1 + b1, 0.0)
    h2 = jnp.maximum(h1 @ w2 + b2, 0.0)
    return h2 @ w3 + b3


if __name__ == "__main__":
    key = jax.random.PRNGKey(0)
    k_params, k_state = jax.random.split(key)

    params = init_params(k_params)
    packed = pack_params(params)

    # small batch of CartPole states, shape (B, state_size) = (8, 4)
    state = jax.random.normal(k_state, (8, STATE_SIZE), jnp.float32)
    value = jax.block_until_ready(critic_forward(state, packed))
    ref = critic_ref(state, params)
    assert value.shape == (8, OUT)
    assert jnp.allclose(value, ref, atol=2e-5, rtol=1e-4)

    # also exercise batch padding + multi-step grid with resident packed weights
    state2 = jax.random.normal(jax.random.PRNGKey(1), (20, STATE_SIZE), jnp.float32)
    value2 = jax.block_until_ready(critic_forward(state2, packed, tb=8))
    ref2 = critic_ref(state2, params)
    assert value2.shape == (20, OUT)
    assert jnp.allclose(value2, ref2, atol=2e-5, rtol=1e-4)

    print("KERNEL_OK")
</pallas_src>

<mosaic_0001>
module attributes {stable_mosaic.version = 11 : i64} {
  func.func @critic_kernel(%arg0: i32, %arg1: memref<8x4xf32, #tpu.memory_space<vmem>>, %arg2: memref<136x256xf32, #tpu.memory_space<vmem>>, %arg3: memref<8x1xf32, #tpu.memory_space<vmem>>) attributes {dimension_semantics = [#tpu.dimension_semantics<parallel>], iteration_bounds = array<i64: 1>, scalar_prefetch = 0 : i64, scratch_operands = 0 : i64, tpu.core_type = #tpu.core_type<tc>, window_params = [{transform_indices = @transform_0, window_bounds = array<i64: 8, 4>}, {pipeline_mode = #tpu.pipeline_mode<synchronous>, transform_indices = @transform_1, window_bounds = array<i64: 136, 256>}, {transform_indices = @transform_2, window_bounds = array<i64: 8, 1>}]} {
    %c0 = arith.constant 0 : index
    %c0_0 = arith.constant 0 : index
    %0 = vector.load %arg1[%c0, %c0_0] : memref<8x4xf32, #tpu.memory_space<vmem>>, vector<8x4xf32>
    %c0_1 = arith.constant 0 : index
    %c0_2 = arith.constant 0 : index
    %1 = vector.load %arg2[%c0_1, %c0_2] : memref<136x256xf32, #tpu.memory_space<vmem>>, vector<8x256xf32>
    %c8 = arith.constant 8 : index
    %c0_3 = arith.constant 0 : index
    %2 = vector.load %arg2[%c8, %c0_3] : memref<136x256xf32, #tpu.memory_space<vmem>>, vector<128x256xf32>
    %3 = vector.extract_strided_slice %0 {offsets = [0, 0], sizes = [8, 1], strides = [1, 1]} : vector<8x4xf32> to vector<8x1xf32>
    %4 = vector.extract_strided_slice %1 {offsets = [0, 0], sizes = [1, 128], strides = [1, 1]} : vector<8x256xf32> to vector<1x128xf32>
    %5 = vector.broadcast %3 : vector<8x1xf32> to vector<8x128xf32>
    %6 = vector.broadcast %4 : vector<1x128xf32> to vector<8x128xf32>
    %7 = arith.mulf %5, %6 : vector<8x128xf32>
    %8 = vector.extract_strided_slice %0 {offsets = [0, 1], sizes = [8, 1], strides = [1, 1]} : vector<8x4xf32> to vector<8x1xf32>
    %9 = vector.extract_strided_slice %1 {offsets = [1, 0], sizes = [1, 128], strides = [1, 1]} : vector<8x256xf32> to vector<1x128xf32>
    %10 = vector.broadcast %8 : vector<8x1xf32> to vector<8x128xf32>
    %11 = vector.broadcast %9 : vector<1x128xf32> to vector<8x128xf32>
    %12 = arith.mulf %10, %11 : vector<8x128xf32>
    %13 = arith.addf %7, %12 : vector<8x128xf32>
    %14 = vector.extract_strided_slice %0 {offsets = [0, 2], sizes = [8, 1], strides = [1, 1]} : vector<8x4xf32> to vector<8x1xf32>
    %15 = vector.extract_strided_slice %1 {offsets = [2, 0], sizes = [1, 128], strides = [1, 1]} : vector<8x256xf32> to vector<1x128xf32>
    %16 = vector.broadcast %14 : vector<8x1xf32> to vector<8x128xf32>
    %17 = vector.broadcast %15 : vector<1x128xf32> to vector<8x128xf32>
    %18 = arith.mulf %16, %17 : vector<8x128xf32>
    %19 = arith.addf %13, %18 : vector<8x128xf32>
    %20 = vector.extract_strided_slice %0 {offsets = [0, 3], sizes = [8, 1], strides = [1, 1]} : vector<8x4xf32> to vector<8x1xf32>
    %21 = vector.extract_strided_slice %1 {offsets = [3, 0], sizes = [1, 128], strides = [1, 1]} : vector<8x256xf32> to vector<1x128xf32>
    %22 = vector.broadcast %20 : vector<8x1xf32> to vector<8x128xf32>
    %23 = vector.broadcast %21 : vector<1x128xf32> to vector<8x128xf32>
    %24 = arith.mulf %22, %23 : vector<8x128xf32>
    %25 = arith.addf %19, %24 : vector<8x128xf32>
    %26 = vector.extract_strided_slice %1 {offsets = [4, 0], sizes = [1, 128], strides = [1, 1]} : vector<8x256xf32> to vector<1x128xf32>
    %27 = vector.broadcast %26 : vector<1x128xf32> to vector<8x128xf32>
    %28 = arith.addf %25, %27 : vector<8x128xf32>
    %cst = arith.constant 0.000000e+00 : f32
    %29 = vector.broadcast %cst : f32 to vector<8x128xf32>
    %30 = arith.maximumf %28, %29 : vector<8x128xf32>
    %cst_4 = arith.constant dense<0.000000e+00> : vector<8x256xf32>
    %31 = tpu.matmul %30, %2, %cst_4 {dimension_numbers = #tpu.dot_dimension_numbers<[1], [0], [0], [1], [0, 0, 1, 1], [], []>} : vector<8x128xf32>, vector<128x256xf32>, vector<8x256xf32> -> vector<8x256xf32>
    %32 = vector.extract_strided_slice %1 {offsets = [7, 0], sizes = [1, 256], strides = [1, 1]} : vector<8x256xf32> to vector<1x256xf32>
    %33 = vector.broadcast %32 : vector<1x256xf32> to vector<8x256xf32>
    %34 = arith.addf %31, %33 : vector<8x256xf32>
    %cst_5 = arith.constant 0.000000e+00 : f32
    %35 = vector.broadcast %cst_5 : f32 to vector<8x256xf32>
    %36 = arith.maximumf %34, %35 : vector<8x256xf32>
    %37 = vector.extract_strided_slice %1 {offsets = [5, 0], sizes = [1, 256], strides = [1, 1]} : vector<8x256xf32> to vector<1x256xf32>
    %38 = vector.broadcast %37 : vector<1x256xf32> to vector<8x256xf32>
    %39 = arith.mulf %36, %38 : vector<8x256xf32>
    %cst_6 = arith.constant dense<0.000000e+00> : vector<8xf32>
    %40 = vector.multi_reduction <add>, %39, %cst_6 [1] : vector<8x256xf32> to vector<8xf32>
    %41 = vector.shape_cast %40 : vector<8xf32> to vector<8x1xf32>
    %42 = vector.extract_strided_slice %1 {offsets = [6, 0], sizes = [1, 1], strides = [1, 1]} : vector<8x256xf32> to vector<1x1xf32>
    %43 = vector.broadcast %42 : vector<1x1xf32> to vector<8x1xf32>
    %44 = arith.addf %41, %43 : vector<8x1xf32>
    %c0_7 = arith.constant 0 : index
    %c0_8 = arith.constant 0 : index
    %45 = vector.load %arg3[%c0_7, %c0_8] : memref<8x1xf32, #tpu.memory_space<vmem>>, vector<8x1xf32>
    tpu.vector_store %arg3[%c0_7, %c0_8], %44 {strides = array<i32>} : memref<8x1xf32, #tpu.memory_space<vmem>>, vector<8x1xf32>,
    return
  }
  func.func @transform_0(%arg0: i32) -> (i32, i32) {
    %c0_i32 = arith.constant 0 : i32
    %c0_i32_0 = arith.constant 0 : i32
    return %arg0, %c0_i32 : i32, i32
  }
  func.func @transform_1(%arg0: i32) -> (i32, i32) {
    %c0_i32 = arith.constant 0 : i32
    %c0_i32_0 = arith.constant 0 : i32
    %c0_i32_1 = arith.constant 0 : i32
    return %c0_i32, %c0_i32_0 : i32, i32
  }
  func.func @transform_2(%arg0: i32) -> (i32, i32) {
    %c0_i32 = arith.constant 0 : i32
    %c0_i32_0 = arith.constant 0 : i32
    return %arg0, %c0_i32 : i32, i32
  }
}

</mosaic_0001>

<bundles_post_ra>
// kernel: tpu_custom_call.1
= control target key start
LH: loop header
LB: loop body
LE: loop exit
PB: predicated region body
PF: predicated region fallthrough
CT: control target
= control target key end

     0   :  { %7 = vsyncpa [#allocation3], 0  ;;  %s281_s9 = smov [#allocation2]   ;;  %s322_s0 = inlined_call_operand.vmem [shape: f32[8,4], index: 0, kind: input, shape index: {}]   ;;  %s323_s1 = inlined_call_operand.hbm [shape: f32[136,256], index: 1, kind: input, shape index: {}]   ;;  %s324_s2 = inlined_call_operand.vmem [shape: f32[8,1], index: 2, kind: output, shape index: {}]  }
   0x1   :  { %s15_s10 = sshll.u32 %s281_s9, 4  ;;  %s257_s13 = scalar_lea.hbm %s323_s1, 4352  ;;  %s16_s10 = int_to_ptr.vmem [resolvable:$true] %s15_s10 }
   0x2   :  { %p258_p0 = scmp.ne.s32.totalorder %s323_s1, %s257_s13  ;;  %p261_p1 = scmp.lt.u32.totalorder %s257_s13, %s323_s1 }
   0x4   :  { %p263_p2 = pnand %p261_p1, %p258_p0 }
   0x6   :  { %266 = shalt.err (!%p263_p2)
}
   0x7   :  { %s267_s18 = scalar_lea.vmem %s16_s10, 4352  ;;  %p272_p4 = scmp.lt.s32.totalorder %s16_s10, %s16_s10 }
   0x8   :  { %p268_p3 = scmp.ne.s32.totalorder %s16_s10, %s267_s18  ;;  %p273_p5 = scmp.lt.s32.totalorder %s267_s18, %s267_s18 }
   0xa   :  { %p274_p6 = por %p273_p5, %p272_p4 }
   0xc   :  { %p275_p7 = pnand %p274_p6, %p268_p3 }
   0xe   :  { %278 = shalt.err (!%p275_p7)
}
   0xf   :  { %s282_s19 = smov 256   ;;  %s283_s20 = smov 16  }
  0x10   :  { %21 = dma.hbm_to_vmem [thread:$0]  %s323_s1, 4352, %s16_s10, [#allocation3], %s282_s19, %s282_s19, %s283_s20  }
  0x11   :  { %279 = dma.done.wait [#allocation3], 4352  }
  0x12   :  { %280 = vsyncadd [#allocation3], 4294962944  ;;  %v284_v0 = vmov 0   ;;  %v285_v1 = vmov 2   ;;  %v25_v2 = vld [vmem:[%s322_s0] sm:$0xff]  ;;  %v29_v3 = vld [vmem:[#allocation2 + $0x18] sm:$0xff]  ;;  %v65_v54 = vlaneseq }
  0x13   :  { %252 = vset.pattern.permute.xlu0 %v284_v0  ;;  %254 = vset.pattern.permute.xlu1 %v285_v1  ;;  %v31_v4 = vld [vmem:[#allocation2 + $0x28] sm:$0xff]  ;;  %v28_v6 = vld [vmem:[#allocation2 + $0x10] sm:$0xff]  ;;  %v30_v7 = vld [vmem:[#allocation2 + $0x20] sm:$0xff]  ;;  %v286_v17 = vmov 1   ;;  %v287_v18 = vmov 3   ;;  %v288_v34 = vmov 0.0  }
  0x14   :  { %62 = vperm.xlu0 %252, %v25_v2   ;;  %81 = vperm.xlu1 %254, %v25_v2   ;;  %v212_v5 = vpack.c.bf16 %v31_v4, %v29_v3  ;;  %v33_v8 = vld [vmem:[#allocation2 + $0x38] sm:$0xff]  ;;  %v214_v9 = vpack.c.bf16 %v30_v7, %v28_v6  ;;  %v35_v10 = vld [vmem:[#allocation2 + $0x48] sm:$0xff]  ;;  %v32_v11 = vld [vmem:[#allocation2 + $0x30] sm:$0xff]  ;;  %v66_v55 = vshrl.u32 %v65_v54, 7  ;;  %vm205_vm0 = vcmask 7168  }
  0x15   :  { %v34_v12 = vld [vmem:[#allocation2 + $0x40] sm:$0xff]  ;;  %v216_v13 = vpack.c.bf16 %v35_v10, %v33_v8  ;;  %v37_v14 = vld [vmem:[#allocation2 + $0x58] sm:$0xff]  ;;  %v39_v15 = vld [vmem:[#allocation2 + $0x68] sm:$0xff]  ;;  %178 = vmatprep.mubr.f32.mxu0 %v288_v34 }
  0x16   :  { %213 = vmatprep.subr.bf16.mxu0 %v212_v5  ;;  %v218_v16 = vpack.c.bf16 %v34_v12, %v32_v11  ;;  %v220_v19 = vpack.c.bf16 %v39_v15, %v37_v14  ;;  %v36_v20 = vld [vmem:[#allocation2 + $0x50] sm:$0xff]  ;;  %v38_v21 = vld [vmem:[#allocation2 + $0x60] sm:$0xff]  ;;  %v41_v22 = vld [vmem:[#allocation2 + $0x78] sm:$0xff]  ;;  %v67_v56 = vsub.s32 0, %v66_v55  ;;  %v76_v57 = vsub.s32 1, %v66_v55 }
  0x17   :  { %215 = vmatpush1.bf16.msra.mxu0 %v214_v9  ;;  %v43_v23 = vld [vmem:[#allocation2 + $0x88] sm:$0xff]  ;;  %v222_v24 = vpack.c.bf16 %v38_v21, %v36_v20  ;;  %v40_v26 = vld [vmem:[#allocation2 + $0x70] sm:$0xff]  ;;  %v42_v27 = vld [vmem:[#allocation2 + $0x80] sm:$0xff]  ;;  %v86_v60 = vsub.s32 2, %v66_v55  ;;  %v96_v62 = vsub.s32 3, %v66_v55  ;;  %v102_v7 = vsub.s32 4, %v66_v55 }
  0x18   :  { %253 = vset.pattern.permute.xlu0 %v286_v17  ;;  %255 = vset.pattern.permute.xlu1 %v287_v18  ;;  %v224_v25 = vpack.c.bf16 %v43_v23, %v41_v22  ;;  %v45_v28 = vld [vmem:[#allocation2 + $0x98] sm:$0xff]  ;;  %v47_v29 = vld [vmem:[#allocation2 + $0xa8] sm:$0xff]  ;;  %v226_v30 = vpack.c.bf16 %v42_v27, %v40_v26  ;;  %v44_v32 = vld [vmem:[#allocation2 + $0x90] sm:$0xff] }
  0x19   :  { %71 = vperm.xlu0 %253, %v25_v2   ;;  %91 = vperm.xlu1 %255, %v25_v2   ;;  %v228_v31 = vpack.c.bf16 %v47_v29, %v45_v28  ;;  %v46_v33 = vld [vmem:[#allocation2 + $0xa0] sm:$0xff]  ;;  %v49_v35 = vld [vmem:[#allocation2 + $0xb8] sm:$0xff]  ;;  %v51_v36 = vld [vmem:[#allocation2 + $0xc8] sm:$0xff] }
  0x1a   :  { %217 = vmatprep.subr.bf16.mxu0 %v216_v13  ;;  %v230_v37 = vpack.c.bf16 %v46_v33, %v44_v32  ;;  %v232_v38 = vpack.c.bf16 %v51_v36, %v49_v35  ;;  %v48_v39 = vld [vmem:[#allocation2 + $0xb0] sm:$0xff]  ;;  %v50_v40 = vld [vmem:[#allocation2 + $0xc0] sm:$0xff]  ;;  %v53_v41 = vld [vmem:[#allocation2 + $0xd8] sm:$0xff]  ;;  %v202_v32 = vsub.s32 6, %v66_v55 }
  0x1b   :  { %219 = vmatpush1.bf16.msra.mxu0 %v218_v16  ;;  %v55_v42 = vld [vmem:[#allocation2 + $0xe8] sm:$0xff]  ;;  %v234_v43 = vpack.c.bf16 %v50_v40, %v48_v39  ;;  %v52_v45 = vld [vmem:[#allocation2 + $0xd0] sm:$0xff]  ;;  %v54_v46 = vld [vmem:[#allocation2 + $0xe0] sm:$0xff]  ;;  %v108_v16 = vsub.s32 7, %v66_v55 }
  0x1c   :  { %221 = vmatprep.subr.bf16.mxu0 %v220_v19  ;;  %v236_v44 = vpack.c.bf16 %v55_v42, %v53_v41  ;;  %v57_v47 = vld [vmem:[#allocation2 + $0xf8] sm:$0xff]  ;;  %v59_v48 = vld [vmem:[#allocation2 + $0x108] sm:$0xff]  ;;  %v238_v49 = vpack.c.bf16 %v54_v46, %v52_v45  ;;  %v56_v51 = vld [vmem:[#allocation2 + $0xf0] sm:$0xff]  ;;  %v189_v19 = vsub.s32 5, %v66_v55 }
  0x1d   :  { %256 = vset.pattern.permute.xlu0 %v287_v18  ;;  %v240_v50 = vpack.c.bf16 %v59_v48, %v57_v47  ;;  %v58_v52 = vld [vmem:[#allocation2 + $0x100] sm:$0xff]  ;;  %v27_v17 = vld [vmem:[#allocation2 + $0x8] sm:$0xff] }
  0x1e   :  { %v242_v53 = vpack.c.bf16 %v58_v52, %v56_v51  ;;  %v26_v58 = vld [vmem:[#allocation2] sm:$0xff]  ;;  %v113_v20 = vrot.slane %v27_v17, %v108_v16  ;;  %v194_v26 = vrot.slane %v27_v17, %v189_v19 }
  0x1f   :  { %223 = vmatpush1.bf16.msra.mxu0 %v222_v24  ;;  %v68_v63 = vrot.slane %v26_v58, %v67_v56  ;;  %v77_v0 = vrot.slane %v26_v58, %v76_v57  ;;  %v87_v1 = vrot.slane %v26_v58, %v86_v60  ;;  %v97_v2 = vrot.slane %v26_v58, %v96_v62 }
  0x20   :  { %225 = vmatprep.subr.bf16.mxu0 %v224_v25  ;;  %v103_v12 = vrot.slane %v26_v58, %v102_v7  ;;  %v109_v18 = vrot.slane %v26_v58, %v108_v16  ;;  %v190_v23 = vrot.slane %v26_v58, %v189_v19  ;;  %v203_v33 = vrot.slane %v26_v58, %v202_v32 }
  0x23   :  { %227 = vmatpush1.bf16.msra.mxu0 %v226_v30 }
  0x24   :  { %229 = vmatprep.subr.bf16.mxu0 %v228_v31 }
  0x27   :  { %231 = vmatpush1.bf16.msra.mxu0 %v230_v37 }
  0x28   :  { %233 = vmatprep.subr.bf16.mxu0 %v232_v38 }
  0x2b   :  { %235 = vmatpush1.bf16.msra.mxu0 %v234_v43 }
  0x2c   :  { %237 = vmatprep.subr.bf16.mxu0 %v236_v44 }
  0x2f   :  { %239 = vmatpush1.bf16.msra.mxu0 %v238_v49 }
  0x30   :  { %241 = vmatprep.subr.bf16.mxu0 %v240_v50 }
  0x33   :  { %243 = vmatpush1.bf16.msra.mxu0 %v242_v53 }
  0x93   :  { %v63_v59 = vpop.permute.xlu0 %62  ;;  %v82_v61 = vpop.permute.xlu1 %81 }
  0x94   :  { %v69_v5 = vmul.f32 %v68_v63, %v63_v59  ;;  %v88_v8 = vmul.f32 %v87_v1, %v82_v61 }
  0x98   :  { %v72_v3 = vpop.permute.xlu0 %71  ;;  %v92_v4 = vpop.permute.xlu1 %91 }
  0x99   :  { %v78_v6 = vmul.f32 %v77_v0, %v72_v3  ;;  %v98_v10 = vmul.f32 %v97_v2, %v92_v4 }
  0x9b   :  { %v79_v9 = vadd.f32 %v78_v6, %v69_v5 }
  0x9d   :  { %v89_v11 = vadd.f32 %v88_v8, %v79_v9 }
  0x9f   :  { %v99_v13 = vadd.f32 %v98_v10, %v89_v11 }
  0xa1   :  { %v104_v14 = vadd.f32 %v103_v12, %v99_v13 }
  0xa3   :  { %v105_v15 = vmax.f32 %v104_v14, 0.0 }
  0xa5   :  { %179 = vmatmul.mubr.f32.vlgmr.msra.gmra.mrb[0].mxu0 %v105_v15 }
 0x178   :  { %v180_v21 = vpop.f32.mrb[0].mxu0 }
 0x179   :  { %v181_v22 = vadd.f32 %v180_v21, %v109_v18  ;;  %v182_v24 = vpop.f32.mrb[1].mxu0 }
 0x17a   :  { %v183_v25 = vadd.f32 %v182_v24, %v113_v20 }
 0x17b   :  { %v185_v27 = vmax.f32 %v181_v22, 0.0 }
 0x17c   :  { %v186_v28 = vmax.f32 %v183_v25, 0.0 }
 0x17d   :  { %v195_v29 = vmul.f32 %v190_v23, %v185_v27 }
 0x17e   :  { %v196_v30 = vmul.f32 %v194_v26, %v186_v28 }
 0x180   :  { %v197_v31 = vadd.f32 %v196_v30, %v195_v29 }
 0x182   :  { %198 = vadd.xlane.f32.xlu1 %v197_v31 }
 0x20f   :  { %v199_v34 = vpop.xlane.xlu1 %198 }
 0x210   :  { %v204_v35 = vadd.f32 %v203_v33, %v199_v34 }
 0x212   :  { %206 = vst.msk [vmem:[%s324_s2] sm:$0xff] %vm205_vm0, %v204_v35 }
 0x213   :  { %211 = vsyncpa [#allocation3], 1 }

</bundles_post_ra>
